<compile_context>
chip_gen: v6e
topology: v6e:2x2x1
jax: 0.10.0
libtpu: 0.0.40
codegen_flags: <defaults>
</compile_context>

<pallas_src>
import math

import jax
import jax.numpy as jnp
from jax.experimental import pallas as pl
from jax.experimental.pallas import tpu as pltpu


def _round_up(x, m):
    return ((x + m - 1) // m) * m


def _disc_kernel(x_ref, w1_ref, b1_ref, w2_ref, b2_ref,
                 w3_ref, b3_ref, w4_ref, b4_ref, o_ref):
    x = x_ref[...]

    # Three hidden layers on the MXU, f32 accumulation, f32 elementwise.
    h = jnp.dot(x, w1_ref[...], preferred_element_type=jnp.float32) + b1_ref[...]
    h = jnp.maximum(h, 0.0)

    h = jnp.dot(h.astype(w2_ref.dtype), w2_ref[...],
                preferred_element_type=jnp.float32) + b2_ref[...]
    h = jnp.maximum(h, 0.0)

    h = jnp.dot(h.astype(w3_ref.dtype), w3_ref[...],
                preferred_element_type=jnp.float32) + b3_ref[...]
    h = jnp.maximum(h, 0.0)

    # Final Linear(H, 1): an N=1 matmul uses 1 of 128/256 MXU columns, so do
    # it on the VPU/XLU instead: elementwise multiply by the (1, H) weight row
    # and reduce along the feature (lane) axis. w4/b4 stay f32.
    z = jnp.sum(h * w4_ref[...], axis=-1, keepdims=True) + b4_ref[...]
    o_ref[...] = jax.nn.sigmoid(z).astype(o_ref.dtype)


def discriminator_forward(x, params, *, tile_b=512, compute_dtype=jnp.float32):
    """x: (B, input_dim) float32. Returns (B,) float32 (matches output.view(-1)).

    tile_b: rows of x processed per grid step (clamped / rounded to 8).
    compute_dtype: dtype for x and the three HxH weights fed to the MXU
                   (jnp.bfloat16 recommended on v6e/v7x; f32 accumulation is
                   always used). Default f32 matches the PyTorch module.
    """
    B, input_dim = x.shape
    w1, b1, w2, b2, w3, b3, w4, b4 = params
    H = w1.shape[1]

    # --- operand preparation (wrapper side, plain XLA) -----------------------
    xc = x.astype(compute_dtype)
    w1c = w1.astype(compute_dtype)
    w2c = w2.astype(compute_dtype)
    w3c = w3.astype(compute_dtype)
    w4_row = w4.reshape(1, H).astype(jnp.float32)   # (H, 1) -> (1, H) row
    b1 = b1.astype(jnp.float32)
    b2 = b2.astype(jnp.float32)
    b3 = b3.astype(jnp.float32)
    b4 = b4.astype(jnp.float32)                      # (1, 1)

    # --- batch tiling --------------------------------------------------------
    tile_b = max(8, min(int(tile_b), _round_up(B, 8)))
    tile_b = _round_up(tile_b, 8)
    num_tiles = pl.cdiv(B, tile_b)
    b_pad = num_tiles * tile_b
    if b_pad != B:
        xc = jnp.pad(xc, ((0, b_pad - B), (0, 0)))

    # --- VMEM budget (v7x has 64 MiB physical VMEM; default scoped is 32) ----
    act_itemsize = jnp.dtype(compute_dtype).itemsize
    weight_bytes = sum(
        math.prod(a.shape) * a.dtype.itemsize
        for a in (w1c, b1, w2c, b2, w3c, b3, w4_row, b4))
    vmem_bytes = (
        2 * weight_bytes                        # resident params (worst case 2x)
        + 2 * tile_b * input_dim * act_itemsize  # double-buffered x tiles
        + 2 * tile_b * 4                         # double-buffered output tiles
        + 6 * tile_b * H * 4                     # f32 intermediates / headroom
    )
    vmem_limit = int(min(max(vmem_bytes, 32 * 1024 * 1024), 64 * 1024 * 1024))

    # --- cost estimate (hint for XLA scheduling around the custom call) ------
    flops = 2 * b_pad * (input_dim * H + 2 * H * H + H) + 5 * b_pad * H
    cost = pl.CostEstimate(
        flops=int(flops),
        transcendentals=int(b_pad),  # sigmoid
        bytes_accessed=int(b_pad * input_dim * act_itemsize
                           + weight_bytes + b_pad * 4),
    )

    weight_specs = [
        pl.BlockSpec(w1c.shape, lambda i: (0, 0)),
        pl.BlockSpec(b1.shape, lambda i: (0, 0)),
        pl.BlockSpec(w2c.shape, lambda i: (0, 0)),
        pl.BlockSpec(b2.shape, lambda i: (0, 0)),
        pl.BlockSpec(w3c.shape, lambda i: (0, 0)),
        pl.BlockSpec(b3.shape, lambda i: (0, 0)),
        pl.BlockSpec(w4_row.shape, lambda i: (0, 0)),
        pl.BlockSpec(b4.shape, lambda i: (0, 0)),
    ]

    out = pl.pallas_call(
        _disc_kernel,
        out_shape=jax.ShapeDtypeStruct((b_pad, 1), jnp.float32),
        grid=(num_tiles,),
        in_specs=[pl.BlockSpec((tile_b, input_dim), lambda i: (i, 0))]
                 + weight_specs,
        out_specs=pl.BlockSpec((tile_b, 1), lambda i: (i, 0)),
        compiler_params=pltpu.CompilerParams(
            dimension_semantics=("parallel",),
            vmem_limit_bytes=vmem_limit,
        ),
        cost_estimate=cost,
    )(xc, w1c, b1, w2c, b2, w3c, b3, w4_row, b4)

    return out[:B, 0]


def init_params(key, input_dim, hidden_dim):
    """Deterministic init matching PyTorch nn.Linear default (uniform +-1/sqrt(fan_in)).
    Weights returned as (in, out) (already transposed for x @ W)."""
    dims = [(input_dim, hidden_dim),
            (hidden_dim, hidden_dim),
            (hidden_dim, hidden_dim),
            (hidden_dim, 1)]
    params = []
    for (fan_in, fan_out) in dims:
        key, kw, kb = jax.random.split(key, 3)
        bound = 1.0 / jnp.sqrt(jnp.float32(fan_in))
        w = jax.random.uniform(kw, (fan_in, fan_out), jnp.float32, -bound, bound)
        b = jax.random.uniform(kb, (1, fan_out), jnp.float32, -bound, bound)
        params.extend([w, b])
    return tuple(params)


def _reference_forward(x, params):
    w1, b1, w2, b2, w3, b3, w4, b4 = params
    h = jnp.maximum(x @ w1 + b1, 0.0)
    h = jnp.maximum(h @ w2 + b2, 0.0)
    h = jnp.maximum(h @ w3 + b3, 0.0)
    z = h @ w4 + b4
    return jax.nn.sigmoid(z).reshape(-1)


if __name__ == "__main__":
    key = jax.random.PRNGKey(0)
    kx, kp = jax.random.split(key)

    batch, input_dim, hidden_dim = 256, 16, 32
    x = jax.random.normal(kx, (batch, input_dim), jnp.float32)
    params = init_params(kp, input_dim, hidden_dim)

    ref = _reference_forward(x, params)

    # Multi-tile path (grid of 2 batch tiles, pipelined x DMAs).
    out = discriminator_forward(x, params, tile_b=128)
    out = jax.block_until_ready(out)
    assert out.shape == (batch,)
    assert jnp.allclose(out, ref, atol=1e-5, rtol=1e-5)

    # Small-batch / single-tile path (tile clamps to the padded batch).
    out_small = jax.block_until_ready(discriminator_forward(x[:8], params))
    assert out_small.shape == (8,)
    assert jnp.allclose(out_small, ref[:8], atol=1e-5, rtol=1e-5)

    print("KERNEL_OK")
</pallas_src>

<mosaic_0001>
module attributes {stable_mosaic.version = 11 : i64} {
  func.func @_disc_kernel(%arg0: i32, %arg1: memref<128x16xf32, #tpu.memory_space<vmem>>, %arg2: memref<16x32xf32, #tpu.memory_space<vmem>>, %arg3: memref<1x32xf32, #tpu.memory_space<vmem>>, %arg4: memref<32x32xf32, #tpu.memory_space<vmem>>, %arg5: memref<1x32xf32, #tpu.memory_space<vmem>>, %arg6: memref<32x32xf32, #tpu.memory_space<vmem>>, %arg7: memref<1x32xf32, #tpu.memory_space<vmem>>, %arg8: memref<1x32xf32, #tpu.memory_space<vmem>>, %arg9: memref<1x1xf32, #tpu.memory_space<vmem>>, %arg10: memref<128x1xf32, #tpu.memory_space<vmem>>) attributes {dimension_semantics = [#tpu.dimension_semantics<parallel>], iteration_bounds = array<i64: 2>, scalar_prefetch = 0 : i64, scratch_operands = 0 : i64, tpu.core_type = #tpu.core_type<tc>, window_params = [{transform_indices = @transform_0, window_bounds = array<i64: 128, 16>}, {pipeline_mode = #tpu.pipeline_mode<synchronous>, transform_indices = @transform_1, window_bounds = array<i64: 16, 32>}, {pipeline_mode = #tpu.pipeline_mode<synchronous>, transform_indices = @transform_2, window_bounds = array<i64: 1, 32>}, {pipeline_mode = #tpu.pipeline_mode<synchronous>, transform_indices = @transform_3, window_bounds = array<i64: 32, 32>}, {pipeline_mode = #tpu.pipeline_mode<synchronous>, transform_indices = @transform_4, window_bounds = array<i64: 1, 32>}, {pipeline_mode = #tpu.pipeline_mode<synchronous>, transform_indices = @transform_5, window_bounds = array<i64: 32, 32>}, {pipeline_mode = #tpu.pipeline_mode<synchronous>, transform_indices = @transform_6, window_bounds = array<i64: 1, 32>}, {pipeline_mode = #tpu.pipeline_mode<synchronous>, transform_indices = @transform_7, window_bounds = array<i64: 1, 32>}, {pipeline_mode = #tpu.pipeline_mode<synchronous>, transform_indices = @transform_8, window_bounds = array<i64: 1, 1>}, {transform_indices = @transform_9, window_bounds = array<i64: 128, 1>}]} {
    %c0 = arith.constant 0 : index
    %c0_0 = arith.constant 0 : index
    %0 = vector.load %arg1[%c0, %c0_0] : memref<128x16xf32, #tpu.memory_space<vmem>>, vector<128x16xf32>
    %c0_1 = arith.constant 0 : index
    %c0_2 = arith.constant 0 : index
    %1 = vector.load %arg2[%c0_1, %c0_2] : memref<16x32xf32, #tpu.memory_space<vmem>>, vector<16x32xf32>
    %cst = arith.constant dense<0.000000e+00> : vector<128x32xf32>
    %2 = tpu.matmul %0, %1, %cst {dimension_numbers = #tpu.dot_dimension_numbers<[1], [0], [0], [1], [0, 0, 1, 1], [], []>} : vector<128x16xf32>, vector<16x32xf32>, vector<128x32xf32> -> vector<128x32xf32>
    %c0_3 = arith.constant 0 : index
    %c0_4 = arith.constant 0 : index
    %3 = vector.load %arg3[%c0_3, %c0_4] : memref<1x32xf32, #tpu.memory_space<vmem>>, vector<1x32xf32>
    %4 = vector.broadcast %3 : vector<1x32xf32> to vector<128x32xf32>
    %5 = arith.addf %2, %4 : vector<128x32xf32>
    %cst_5 = arith.constant 0.000000e+00 : f32
    %6 = vector.broadcast %cst_5 : f32 to vector<128x32xf32>
    %7 = arith.maximumf %5, %6 : vector<128x32xf32>
    %c0_6 = arith.constant 0 : index
    %c0_7 = arith.constant 0 : index
    %8 = vector.load %arg4[%c0_6, %c0_7] : memref<32x32xf32, #tpu.memory_space<vmem>>, vector<32x32xf32>
    %cst_8 = arith.constant dense<0.000000e+00> : vector<128x32xf32>
    %9 = tpu.matmul %7, %8, %cst_8 {dimension_numbers = #tpu.dot_dimension_numbers<[1], [0], [0], [1], [0, 0, 1, 1], [], []>} : vector<128x32xf32>, vector<32x32xf32>, vector<128x32xf32> -> vector<128x32xf32>
    %c0_9 = arith.constant 0 : index
    %c0_10 = arith.constant 0 : index
    %10 = vector.load %arg5[%c0_9, %c0_10] : memref<1x32xf32, #tpu.memory_space<vmem>>, vector<1x32xf32>
    %11 = vector.broadcast %10 : vector<1x32xf32> to vector<128x32xf32>
    %12 = arith.addf %9, %11 : vector<128x32xf32>
    %cst_11 = arith.constant 0.000000e+00 : f32
    %13 = vector.broadcast %cst_11 : f32 to vector<128x32xf32>
    %14 = arith.maximumf %12, %13 : vector<128x32xf32>
    %c0_12 = arith.constant 0 : index
    %c0_13 = arith.constant 0 : index
    %15 = vector.load %arg6[%c0_12, %c0_13] : memref<32x32xf32, #tpu.memory_space<vmem>>, vector<32x32xf32>
    %cst_14 = arith.constant dense<0.000000e+00> : vector<128x32xf32>
    %16 = tpu.matmul %14, %15, %cst_14 {dimension_numbers = #tpu.dot_dimension_numbers<[1], [0], [0], [1], [0, 0, 1, 1], [], []>} : vector<128x32xf32>, vector<32x32xf32>, vector<128x32xf32> -> vector<128x32xf32>
    %c0_15 = arith.constant 0 : index
    %c0_16 = arith.constant 0 : index
    %17 = vector.load %arg7[%c0_15, %c0_16] : memref<1x32xf32, #tpu.memory_space<vmem>>, vector<1x32xf32>
    %18 = vector.broadcast %17 : vector<1x32xf32> to vector<128x32xf32>
    %19 = arith.addf %16, %18 : vector<128x32xf32>
    %cst_17 = arith.constant 0.000000e+00 : f32
    %20 = vector.broadcast %cst_17 : f32 to vector<128x32xf32>
    %21 = arith.maximumf %19, %20 : vector<128x32xf32>
    %c0_18 = arith.constant 0 : index
    %c0_19 = arith.constant 0 : index
    %22 = vector.load %arg8[%c0_18, %c0_19] : memref<1x32xf32, #tpu.memory_space<vmem>>, vector<1x32xf32>
    %23 = vector.broadcast %22 : vector<1x32xf32> to vector<128x32xf32>
    %24 = arith.mulf %21, %23 : vector<128x32xf32>
    %cst_20 = arith.constant dense<0.000000e+00> : vector<128xf32>
    %25 = vector.multi_reduction <add>, %24, %cst_20 [1] : vector<128x32xf32> to vector<128xf32>
    %26 = vector.shape_cast %25 : vector<128xf32> to vector<128x1xf32>
    %c0_21 = arith.constant 0 : index
    %c0_22 = arith.constant 0 : index
    %27 = vector.load %arg9[%c0_21, %c0_22] : memref<1x1xf32, #tpu.memory_space<vmem>>, vector<1x1xf32>
    %28 = vector.broadcast %27 : vector<1x1xf32> to vector<128x1xf32>
    %29 = arith.addf %26, %28 : vector<128x1xf32>
    %30 = arith.negf %29 : vector<128x1xf32>
    %31 = math.exp %30 : vector<128x1xf32>
    %cst_23 = arith.constant 1.000000e+00 : f32
    %32 = vector.broadcast %cst_23 : f32 to vector<128x1xf32>
    %33 = arith.addf %32, %31 : vector<128x1xf32>
    %34 = arith.divf %32, %33 : vector<128x1xf32>
    %c0_24 = arith.constant 0 : index
    %c0_25 = arith.constant 0 : index
    %35 = vector.load %arg10[%c0_24, %c0_25] : memref<128x1xf32, #tpu.memory_space<vmem>>, vector<128x1xf32>
    tpu.vector_store %arg10[%c0_24, %c0_25], %34 {strides = array<i32>} : memref<128x1xf32, #tpu.memory_space<vmem>>, vector<128x1xf32>,
    return
  }
  func.func @transform_0(%arg0: i32) -> (i32, i32) {
    %c0_i32 = arith.constant 0 : i32
    %c0_i32_0 = arith.constant 0 : i32
    return %arg0, %c0_i32 : i32, i32
  }
  func.func @transform_1(%arg0: i32) -> (i32, i32) {
    %c0_i32 = arith.constant 0 : i32
    %c0_i32_0 = arith.constant 0 : i32
    %c0_i32_1 = arith.constant 0 : i32
    return %c0_i32, %c0_i32_0 : i32, i32
  }
  func.func @transform_2(%arg0: i32) -> (i32, i32) {
    %c0_i32 = arith.constant 0 : i32
    %c0_i32_0 = arith.constant 0 : i32
    %c0_i32_1 = arith.constant 0 : i32
    return %c0_i32, %c0_i32_0 : i32, i32
  }
  func.func @transform_3(%arg0: i32) -> (i32, i32) {
    %c0_i32 = arith.constant 0 : i32
    %c0_i32_0 = arith.constant 0 : i32
    %c0_i32_1 = arith.constant 0 : i32
    return %c0_i32, %c0_i32_0 : i32, i32
  }
  func.func @transform_4(%arg0: i32) -> (i32, i32) {
    %c0_i32 = arith.constant 0 : i32
    %c0_i32_0 = arith.constant 0 : i32
    %c0_i32_1 = arith.constant 0 : i32
    return %c0_i32, %c0_i32_0 : i32, i32
  }
  func.func @transform_5(%arg0: i32) -> (i32, i32) {
    %c0_i32 = arith.constant 0 : i32
    %c0_i32_0 = arith.constant 0 : i32
    %c0_i32_1 = arith.constant 0 : i32
    return %c0_i32, %c0_i32_0 : i32, i32
  }
  func.func @transform_6(%arg0: i32) -> (i32, i32) {
    %c0_i32 = arith.constant 0 : i32
    %c0_i32_0 = arith.constant 0 : i32
    %c0_i32_1 = arith.constant 0 : i32
    return %c0_i32, %c0_i32_0 : i32, i32
  }
  func.func @transform_7(%arg0: i32) -> (i32, i32) {
    %c0_i32 = arith.constant 0 : i32
    %c0_i32_0 = arith.constant 0 : i32
    %c0_i32_1 = arith.constant 0 : i32
    return %c0_i32, %c0_i32_0 : i32, i32
  }
  func.func @transform_8(%arg0: i32) -> (i32, i32) {
    %c0_i32 = arith.constant 0 : i32
    %c0_i32_0 = arith.constant 0 : i32
    %c0_i32_1 = arith.constant 0 : i32
    return %c0_i32, %c0_i32_0 : i32, i32
  }
  func.func @transform_9(%arg0: i32) -> (i32, i32) {
    %c0_i32 = arith.constant 0 : i32
    %c0_i32_0 = arith.constant 0 : i32
    return %arg0, %c0_i32 : i32, i32
  }
}

</mosaic_0001>

<bundles_post_ra>
// kernel: tpu_custom_call.1
= control target key start
LH: loop header
LB: loop body
LE: loop exit
PB: predicated region body
PF: predicated region fallthrough
CT: control target
= control target key end

     0   :  { %s1644_s11 = smov 0   ;;  %s1880_s0 = inlined_call_operand.vmem [shape: f32[256,16], index: 0, kind: input, shape index: {}]   ;;  %s1881_s1 = inlined_call_operand.vmem [shape: f32[16,32], index: 1, kind: input, shape index: {}]   ;;  %s1882_s2 = inlined_call_operand.vmem [shape: f32[1,32], index: 2, kind: input, shape index: {}]   ;;  %s1883_s3 = inlined_call_operand.vmem [shape: f32[32,32], index: 3, kind: input, shape index: {}]   ;;  %s1884_s4 = inlined_call_operand.vmem [shape: f32[1,32], index: 4, kind: input, shape index: {}]   ;;  %s1885_s5 = inlined_call_operand.vmem [shape: f32[32,32], index: 5, kind: input, shape index: {}]   ;;  %s1886_s6 = inlined_call_operand.vmem [shape: f32[1,32], index: 6, kind: input, shape index: {}]   ;;  %s1887_s7 = inlined_call_operand.vmem [shape: f32[1,32], index: 7, kind: input, shape index: {}]   ;;  %s1888_s8 = inlined_call_operand.<no memory space> [shape: f32[1,1], index: 8, kind: input, shape index: {}]   ;;  %s1889_s9 = inlined_call_operand.vmem [shape: f32[256,1], index: 9, kind: output, shape index: {}]  }
   0x1   :  { %v14_v0 = vstv %s1888_s8 }
   0x2   :  { %15 = vst [vmem:[#allocation2] sm:$0x1] %v14_v0 }
   0x3 LB: > { %s1277_s12 = sadd.s32 4294967295, %s1589_s11   ;;  %p1281_p0 = scmp.ge.s32.totalorder %s1589_s11, 1  ;;  %s1589_s11 = sphi %s1644_s11, %s21_s11  }
   0x4   : > { %p290_p1 = scmp.lt.s32.totalorder %s1589_s11, 3 }
   0x6   : > { %p291_p2 = pnand %p1281_p0, %p290_p1 }
   0x7   : > { %s1282_s16 = sshll.u32 (!%p291_p2), %s1277_s12, 4 }
   0x8   : > { %294 = sbr.rel (%p291_p2) target bundleno = 824 (0x338), region = 56  ;;  %p327_p3 = scmp.lt.s32.totalorder (!%p291_p2), %s1282_s16, 31 }
   0xd   : > { %v355_v1 = vld [vmem:[%s1881_s1 + $0x8] sm:$0xff]  ;;  %v354_v2 = vld [vmem:[%s1881_s1] sm:$0xff]  ;;  %v576_v3 = vld [vmem:[%s1883_s3 + $0x18] sm:$0xff]  ;;  %s1891_s16 = smov (!%p327_p3, %s1282_s16), 31  ;;  %vm363_vm0 = vcmask 130048   ;;  %vm584_vm1 = vcmask 261120  }
   0xe   : > { %1415 = vmatprep.subr.mxu0 %v355_v1  ;;  %1507 = vmatprep.subr.mxu1 %v355_v1  ;;  %s1283_s19 = sshll.u32 %s1891_s16, 3  ;;  %v575_v8 = vld [vmem:[%s1883_s3 + $0x10] sm:$0xff]  ;;  %v574_v14 = vld [vmem:[%s1883_s3 + $0x8] sm:$0xff]  ;;  %v573_v22 = vld [vmem:[%s1883_s3] sm:$0xff]  ;;  %vm1204_vm2 = vcmask 7168  }
   0xf   : > { %1416 = vmatpush3.msra.mxu0 %v355_v1  ;;  %1509 = vmatpush3.msra.mxu1 %v355_v1  ;;  %s1669_s22 = scalar_lea.vmem %s1880_s0, %s1283_s19  ;;  %v797_v23 = vld [vmem:[%s1885_s5 + $0x18] sm:$0xff]  ;;  %v796_v24 = vld [vmem:[%s1885_s5 + $0x10] sm:$0xff]  ;;  %v795_v25 = vld [vmem:[%s1885_s5 + $0x8] sm:$0xff]  ;;  %s1842_s28 = scalar_lea.vmem %s1889_s9, %s1283_s19 }
  0x10   : > { %1417 = vmatprep.subr.mxu0 %v354_v2  ;;  %1508 = vmatprep.subr.mxu1 %v354_v2  ;;  %v338_v4 = vld [vmem:[%s1669_s22] sm:$0xff]  ;;  %v339_v5 = vld [vmem:[%s1669_s22 + $0x8] sm:$0xff]  ;;  %v340_v6 = vld [vmem:[%s1669_s22 + $0x10] sm:$0xff] }
  0x11   : > { %1418 = vmatpush3.msra.mxu0 %v354_v2  ;;  %1510 = vmatpush3.msra.mxu1 %v354_v2  ;;  %v346_v7 = vld [vmem:[%s1669_s22 + $0x40] sm:$0xff]  ;;  %v341_v9 = vld [vmem:[%s1669_s22 + $0x18] sm:$0xff]  ;;  %v347_v10 = vld [vmem:[%s1669_s22 + $0x48] sm:$0xff] }
  0x12   : > { %1443 = vmatprep.subr.mxu1 %v576_v3  ;;  %1419 = vmatprep.mubr.msk.f32.mxu0 %vm363_vm0, %v338_v4  ;;  %v348_v11 = vld [vmem:[%s1669_s22 + $0x50] sm:$0xff]  ;;  %v342_v12 = vld [vmem:[%s1669_s22 + $0x20] sm:$0xff]  ;;  %v349_v13 = vld [vmem:[%s1669_s22 + $0x58] sm:$0xff] }
  0x13   : > { %1420 = vmatmul.mubr.msk.f32.vlgmr.msra.gmra.mxu0 %vm363_vm0, %v339_v5  ;;  %1431 = vmatprep.mubr.msk.f32.mxu1 %vm363_vm0, %v346_v7  ;;  %v350_v15 = vld [vmem:[%s1669_s22 + $0x60] sm:$0xff]  ;;  %v343_v16 = vld [vmem:[%s1669_s22 + $0x28] sm:$0xff]  ;;  %v344_v17 = vld [vmem:[%s1669_s22 + $0x30] sm:$0xff] }
  0x14   : > { %1422 = vmatprep.mubr.msk.f32.mxu0 %vm363_vm0, %v340_v6  ;;  %1432 = vmatmul.mubr.msk.f32.vlgmr.msra.gmra.mxu1 %vm363_vm0, %v347_v10  ;;  %v351_v18 = vld [vmem:[%s1669_s22 + $0x68] sm:$0xff]  ;;  %v352_v19 = vld [vmem:[%s1669_s22 + $0x70] sm:$0xff]  ;;  %v345_v20 = vld [vmem:[%s1669_s22 + $0x38] sm:$0xff] }
  0x15   : > { %1434 = vmatprep.mubr.msk.f32.mxu1 %vm363_vm0, %v348_v11  ;;  %1444 = vmatpush3.msra.mxu1 %v576_v3  ;;  %v353_v21 = vld [vmem:[%s1669_s22 + $0x78] sm:$0xff]  ;;  %v1286_v26 = vld [vmem:[%s1882_s2] ss:$0 sm:$0xff] }
  0x16   : > { %1445 = vmatprep.subr.mxu1 %v575_v8  ;;  %1475 = vmatprep.subr.mxu0 %v797_v23  ;;  %v794_v11 = vld [vmem:[%s1885_s5] sm:$0xff] }
  0x17   : > { %1423 = vmatmul.mubr.msk.f32.gmra.mxu0 %vm363_vm0, %v341_v9  ;;  %1446 = vmatpush3.msra.mxu1 %v575_v8 }
  0x18   : > { %1425 = vmatprep.mubr.msk.f32.mxu0 %vm363_vm0, %v342_v12  ;;  %1435 = vmatmul.mubr.msk.f32.gmra.mxu1 %vm363_vm0, %v349_v13  ;;  %v1303_v12 = vld [vmem:[%s1884_s4] ss:$0 sm:$0xff] }
  0x19   : > { %1447 = vmatprep.subr.mxu1 %v574_v14  ;;  %1437 = vmatprep.mubr.msk.f32.mxu1 %vm363_vm0, %v350_v15 }
  0x1a   : > { %1448 = vmatpush3.msra.mxu1 %v574_v14  ;;  %1476 = vmatpush3.msra.mxu0 %v797_v23 }
  0x1b   : > { %1426 = vmatmul.mubr.msk.f32.gmra.mxu0 %vm363_vm0, %v343_v16  ;;  %1449 = vmatprep.subr.mxu1 %v573_v22 }
  0x1c   : > { %1428 = vmatprep.mubr.msk.f32.mxu0 %vm363_vm0, %v344_v17  ;;  %1438 = vmatmul.mubr.msk.f32.gmra.mxu1 %vm363_vm0, %v351_v18 }
  0x1d   : > { %1440 = vmatprep.mubr.msk.f32.mxu1 %vm363_vm0, %v352_v19  ;;  %1450 = vmatpush3.msra.mxu1 %v573_v22 }
  0x1e   : > { %1477 = vmatprep.subr.mxu0 %v796_v24 }
  0x1f   : > { %1429 = vmatmul.mubr.msk.f32.gmra.mxu0 %vm363_vm0, %v345_v20 }
  0x20   : > { %1441 = vmatmul.mubr.msk.f32.gmra.mxu1 %vm363_vm0, %v353_v21  ;;  %1478 = vmatpush3.msra.mxu0 %v796_v24 }
  0x21   : > { %1479 = vmatprep.subr.mxu0 %v795_v25 }
  0x22   : > { %1480 = vmatpush3.msra.mxu0 %v795_v25 }
  0x23   : > { %1481 = vmatprep.subr.mxu0 %v794_v11 }
  0x24   : > { %1482 = vmatpush3.msra.mxu0 %v794_v11 }
  0xd3   : > { %v1421_v27 = vpop.f32.mrf.mxu0 }
  0xd4   : > { %v484_v28 = vadd.f32 %v1421_v27, %v1286_v26  ;;  %v1433_v30 = vpop.f32.mrf.mxu1 }
  0xd5   : > { %v478_v29 = vpop.f32.mrf.mxu0  ;;  %v524_v57 = vadd.f32 %v1433_v30, %v1286_v26 }
  0xd6   : > { %v479_v31 = vadd.f32 %v1286_v26, %v478_v29  ;;  %v518_v33 = vpop.f32.mrf.mxu1  ;;  %v558_v35 = vmax.f32 %v484_v28, 0.0 }
  0xd7   : > { %v1424_v32 = vpop.f32.mrf.mxu0  ;;  %v519_v52 = vadd.f32 %v1286_v26, %v518_v33  ;;  %v566_v62 = vmax.f32 %v524_v57, 0.0 }
  0xd8   : > { %v557_v34 = vmax.f32 %v479_v31, 0.0  ;;  %v494_v36 = vadd.f32 %v1424_v32, %v1286_v26  ;;  %v1436_v38 = vpop.f32.mrf.mxu1 }
  0xd9   : > { %v488_v37 = vpop.f32.mrf.mxu0  ;;  %v565_v59 = vmax.f32 %v519_v52, 0.0  ;;  %v534_v63 = vadd.f32 %v1436_v38, %v1286_v26 }
  0xda   : > { %v489_v39 = vadd.f32 %v1286_v26, %v488_v37  ;;  %1451 = vmatprep.mubr.msk.f32.mxu1 %vm584_vm1, %v557_v34  ;;  %v528_v41 = vpop.f32.mrf.mxu1  ;;  %v560_v44 = vmax.f32 %v494_v36, 0.0 }
  0xdb   : > { %v1427_v40 = vpop.f32.mrf.mxu0  ;;  %1452 = vmatmul.mubr.msk.f32.vlgmr.msra.gmra.mxu1 %vm584_vm1, %v558_v35  ;;  %v529_v60 = vadd.f32 %v1286_v26, %v528_v41  ;;  %v568_v3 = vmax.f32 %v534_v63, 0.0 }
  0xdc   : > { %v559_v42 = vmax.f32 %v489_v39, 0.0  ;;  %v504_v43 = vadd.f32 %v1427_v40, %v1286_v26  ;;  %v1439_v46 = vpop.f32.mrf.mxu1 }
  0xdd   : > { %v498_v45 = vpop.f32.mrf.mxu0  ;;  %v567_v0 = vmax.f32 %v529_v60, 0.0  ;;  %v544_v4 = vadd.f32 %v1439_v46, %v1286_v26 }
  0xde   : > { %v499_v47 = vadd.f32 %v1286_v26, %v498_v45  ;;  %1454 = vmatprep.mubr.msk.f32.mxu1 %vm584_vm1, %v559_v42  ;;  %v562_v48 = vmax.f32 %v504_v43, 0.0  ;;  %v538_v54 = vpop.f32.mrf.mxu1 }
  0xdf   : > { %v1430_v49 = vpop.f32.mrf.mxu0  ;;  %1455 = vmatmul.mubr.msk.f32.gmra.mxu1 %vm584_vm1, %v560_v44  ;;  %v539_v1 = vadd.f32 %v1286_v26, %v538_v54  ;;  %v570_v7 = vmax.f32 %v544_v4, 0.0 }
  0xe0   : > { %v561_v50 = vmax.f32 %v499_v47, 0.0  ;;  %v514_v51 = vadd.f32 %v1430_v49, %v1286_v26  ;;  %v1442_v61 = vpop.f32.mrf.mxu1 }
  0xe1   : > { %v508_v53 = vpop.f32.mrf.mxu0  ;;  %v569_v5 = vmax.f32 %v539_v1, 0.0  ;;  %v554_v8 = vadd.f32 %v1442_v61, %v1286_v26  ;;  %v1765_v61 = vld [vmem:[%s1886_s6] ss:$0 sm:$0xff] }
  0xe2   : > { %v509_v55 = vadd.f32 %v1286_v26, %v508_v53  ;;  %1457 = vmatprep.mubr.msk.f32.mxu1 %vm584_vm1, %v561_v50  ;;  %v564_v56 = vmax.f32 %v514_v51, 0.0  ;;  %v548_v2 = vpop.f32.mrf.mxu1  ;;  %v1771_v1 = vld [vmem:[%s1887_s7] ss:$0 sm:$0xff] }
  0xe3   : > { %1458 = vmatmul.mubr.msk.f32.gmra.mxu1 %vm584_vm1, %v562_v48  ;;  %v549_v6 = vadd.f32 %v1286_v26, %v548_v2  ;;  %v572_v10 = vmax.f32 %v554_v8, 0.0 }
  0xe4   : > { %v563_v58 = vmax.f32 %v509_v55, 0.0 }
  0xe5   : > { %v571_v9 = vmax.f32 %v549_v6, 0.0 }
  0xe6   : > { %1460 = vmatprep.mubr.msk.f32.mxu1 %vm584_vm1, %v563_v58 }
  0xe7   : > { %1461 = vmatmul.mubr.msk.f32.gmra.mxu1 %vm584_vm1, %v564_v56 }
  0xe8   : > { %1463 = vmatprep.mubr.msk.f32.mxu1 %vm584_vm1, %v565_v59 }
  0xeb   : > { %1464 = vmatmul.mubr.msk.f32.gmra.mxu1 %vm584_vm1, %v566_v62 }
  0xec   : > { %1466 = vmatprep.mubr.msk.f32.mxu1 %vm584_vm1, %v567_v0 }
  0xef   : > { %1467 = vmatmul.mubr.msk.f32.gmra.mxu1 %vm584_vm1, %v568_v3 }
  0xf0   : > { %1469 = vmatprep.mubr.msk.f32.mxu1 %vm584_vm1, %v569_v5 }
  0xf3   : > { %1470 = vmatmul.mubr.msk.f32.gmra.mxu1 %vm584_vm1, %v570_v7 }
  0xf4   : > { %1472 = vmatprep.mubr.msk.f32.mxu1 %vm584_vm1, %v571_v9 }
  0xf7   : > { %1473 = vmatmul.mubr.msk.f32.gmra.mxu1 %vm584_vm1, %v572_v10 }
 0x19b   : > { %v1453_v13 = vpop.f32.mrf.mxu1 }
 0x19c   : > { %v705_v14 = vadd.f32 %v1453_v13, %v1303_v12 }
 0x19d   : > { %v699_v15 = vpop.f32.mrf.mxu1 }
 0x19e   : > { %v700_v16 = vadd.f32 %v1303_v12, %v699_v15  ;;  %v779_v19 = vmax.f32 %v705_v14, 0.0 }
 0x19f   : > { %v1456_v17 = vpop.f32.mrf.mxu1 }
 0x1a0   : > { %v778_v18 = vmax.f32 %v700_v16, 0.0  ;;  %v715_v20 = vadd.f32 %v1456_v17, %v1303_v12 }
 0x1a1   : > { %v709_v21 = vpop.f32.mrf.mxu1 }
 0x1a2   : > { %v710_v22 = vadd.f32 %v1303_v12, %v709_v21  ;;  %1483 = vmatprep.mubr.msk.f32.mxu0 %vm584_vm1, %v778_v18  ;;  %v781_v25 = vmax.f32 %v715_v20, 0.0 }
 0x1a3   : > { %v1459_v23 = vpop.f32.mrf.mxu1  ;;  %1484 = vmatmul.mubr.msk.f32.vlgmr.msra.gmra.mxu0 %vm584_vm1, %v779_v19 }
 0x1a4   : > { %v780_v24 = vmax.f32 %v710_v22, 0.0  ;;  %v725_v26 = vadd.f32 %v1459_v23, %v1303_v12 }
 0x1a5   : > { %v719_v27 = vpop.f32.mrf.mxu1 }
 0x1a6   : > { %v720_v28 = vadd.f32 %v1303_v12, %v719_v27  ;;  %1486 = vmatprep.mubr.msk.f32.mxu0 %vm584_vm1, %v780_v24  ;;  %v783_v31 = vmax.f32 %v725_v26, 0.0 }
 0x1a7   : > { %v1462_v29 = vpop.f32.mrf.mxu1  ;;  %1487 = vmatmul.mubr.msk.f32.gmra.mxu0 %vm584_vm1, %v781_v25 }
 0x1a8   : > { %v782_v30 = vmax.f32 %v720_v28, 0.0  ;;  %v735_v32 = vadd.f32 %v1462_v29, %v1303_v12 }
 0x1a9   : > { %v729_v33 = vpop.f32.mrf.mxu1 }
 0x1aa   : > { %v730_v34 = vadd.f32 %v1303_v12, %v729_v33  ;;  %1489 = vmatprep.mubr.msk.f32.mxu0 %vm584_vm1, %v782_v30  ;;  %v785_v37 = vmax.f32 %v735_v32, 0.0 }
 0x1ab   : > { %v1465_v35 = vpop.f32.mrf.mxu1  ;;  %1490 = vmatmul.mubr.msk.f32.gmra.mxu0 %vm584_vm1, %v783_v31 }
 0x1ac   : > { %v784_v36 = vmax.f32 %v730_v34, 0.0  ;;  %v745_v38 = vadd.f32 %v1465_v35, %v1303_v12 }
 0x1ad   : > { %v739_v39 = vpop.f32.mrf.mxu1 }
 0x1ae   : > { %v740_v40 = vadd.f32 %v1303_v12, %v739_v39  ;;  %1492 = vmatprep.mubr.msk.f32.mxu0 %vm584_vm1, %v784_v36  ;;  %v787_v43 = vmax.f32 %v745_v38, 0.0 }
 0x1af   : > { %v1468_v41 = vpop.f32.mrf.mxu1  ;;  %1493 = vmatmul.mubr.msk.f32.gmra.mxu0 %vm584_vm1, %v785_v37 }
 0x1b0   : > { %v786_v42 = vmax.f32 %v740_v40, 0.0  ;;  %v755_v44 = vadd.f32 %v1468_v41, %v1303_v12 }
 0x1b1   : > { %v749_v45 = vpop.f32.mrf.mxu1 }
 0x1b2   : > { %v750_v46 = vadd.f32 %v1303_v12, %v749_v45  ;;  %1495 = vmatprep.mubr.msk.f32.mxu0 %vm584_vm1, %v786_v42  ;;  %v789_v49 = vmax.f32 %v755_v44, 0.0 }
 0x1b3   : > { %v1471_v47 = vpop.f32.mrf.mxu1  ;;  %1496 = vmatmul.mubr.msk.f32.gmra.mxu0 %vm584_vm1, %v787_v43 }
 0x1b4   : > { %v788_v48 = vmax.f32 %v750_v46, 0.0  ;;  %v765_v50 = vadd.f32 %v1471_v47, %v1303_v12 }
 0x1b5   : > { %v759_v51 = vpop.f32.mrf.mxu1 }
 0x1b6   : > { %v760_v52 = vadd.f32 %v1303_v12, %v759_v51  ;;  %1498 = vmatprep.mubr.msk.f32.mxu0 %vm584_vm1, %v788_v48  ;;  %v791_v55 = vmax.f32 %v765_v50, 0.0 }
 0x1b7   : > { %v1474_v53 = vpop.f32.mrf.mxu1  ;;  %1499 = vmatmul.mubr.msk.f32.gmra.mxu0 %vm584_vm1, %v789_v49 }
 0x1b8   : > { %v790_v54 = vmax.f32 %v760_v52, 0.0  ;;  %v775_v56 = vadd.f32 %v1474_v53, %v1303_v12 }
 0x1b9   : > { %v769_v57 = vpop.f32.mrf.mxu1 }
 0x1ba   : > { %v770_v58 = vadd.f32 %v1303_v12, %v769_v57  ;;  %1501 = vmatprep.mubr.msk.f32.mxu0 %vm584_vm1, %v790_v54  ;;  %v793_v60 = vmax.f32 %v775_v56, 0.0 }
 0x1bb   : > { %1502 = vmatmul.mubr.msk.f32.gmra.mxu0 %vm584_vm1, %v791_v55 }
 0x1bc   : > { %v792_v59 = vmax.f32 %v770_v58, 0.0 }
 0x1be   : > { %1504 = vmatprep.mubr.msk.f32.mxu0 %vm584_vm1, %v792_v59 }
 0x1bf   : > { %1505 = vmatmul.mubr.msk.f32.gmra.mxu0 %vm584_vm1, %v793_v60 }
 0x263   : > { %v1485_v62 = vpop.f32.mrf.mxu0 }
 0x264   : > { %v925_v63 = vadd.f32 %v1485_v62, %v1765_v61 }
 0x265   : > { %v919_v0 = vpop.f32.mrf.mxu0 }
 0x266   : > { %v999_v2 = vmax.f32 %v925_v63, 0.0  ;;  %v920_v3 = vadd.f32 %v1765_v61, %v919_v0 }
 0x267   : > { %v1488_v4 = vpop.f32.mrf.mxu0 }
 0x268   : > { %v998_v5 = vmax.f32 %v920_v3, 0.0  ;;  %v935_v6 = vadd.f32 %v1488_v4, %v1765_v61  ;;  %v1022_v7 = vmul.f32 %v1771_v1, %v999_v2 }
 0x269   : > { %v929_v8 = vpop.f32.mrf.mxu0 }
 0x26a   : > { %v1001_v9 = vmax.f32 %v935_v6, 0.0  ;;  %v930_v10 = vadd.f32 %v1765_v61, %v929_v8  ;;  %v1040_v11 = vsel %vm584_vm1, %v1022_v7, 0.0  ;;  %v1021_v12 = vmul.f32 %v1771_v1, %v998_v5 }
 0x26b   : > { %1041 = vadd.xlane.f32.xlu0 %v1040_v11  ;;  %v1491_v13 = vpop.f32.mrf.mxu0 }
 0x26c   : > { %v1000_v14 = vmax.f32 %v930_v10, 0.0  ;;  %v945_v15 = vadd.f32 %v1491_v13, %v1765_v61  ;;  %v1024_v16 = vmul.f32 %v1771_v1, %v1001_v9  ;;  %v1037_v18 = vsel %vm584_vm1, %v1021_v12, 0.0 }
 0x26d   : > { %v939_v17 = vpop.f32.mrf.mxu0 }
 0x26e   : > { %v1003_v19 = vmax.f32 %v945_v15, 0.0  ;;  %v940_v20 = vadd.f32 %v1765_v61, %v939_v17  ;;  %v1046_v21 = vsel %vm584_vm1, %v1024_v16, 0.0  ;;  %v1023_v22 = vmul.f32 %v1771_v1, %v1000_v14  ;;  %v1820_v16 = vld [vmem:[#allocation2] ss:$0 sm:$0xff] }
 0x26f   : > { %1047 = vadd.xlane.f32.xlu1 %v1046_v21  ;;  %v1494_v23 = vpop.f32.mrf.mxu0  ;;  %1038 = vadd.xlane.f32.xlu0 %v1037_v18 }
 0x270   : > { %v1002_v24 = vmax.f32 %v940_v20, 0.0  ;;  %v955_v25 = vadd.f32 %v1494_v23, %v1765_v61  ;;  %v1043_v27 = vsel %vm584_vm1, %v1023_v22, 0.0  ;;  %v1026_v31 = vmul.f32 %v1771_v1, %v1003_v19 }
 0x271   : > { %v949_v26 = vpop.f32.mrf.mxu0 }
 0x272   : > { %v1005_v28 = vmax.f32 %v955_v25, 0.0  ;;  %v950_v29 = vadd.f32 %v1765_v61, %v949_v26  ;;  %v1025_v30 = vmul.f32 %v1771_v1, %v1002_v24  ;;  %v1052_v40 = vsel %vm584_vm1, %v1026_v31, 0.0 }
 0x273   : > { %v1497_v32 = vpop.f32.mrf.mxu0  ;;  %1044 = vadd.xlane.f32.xlu1 %v1043_v27 }
 0x274   : > { %v1004_v33 = vmax.f32 %v950_v29, 0.0  ;;  %v965_v34 = vadd.f32 %v1497_v32, %v1765_v61  ;;  %v1049_v35 = vsel %vm584_vm1, %v1025_v30, 0.0  ;;  %v1028_v37 = vmul.f32 %v1771_v1, %v1005_v28 }
 0x275   : > { %v959_v36 = vpop.f32.mrf.mxu0  ;;  %1050 = vadd.xlane.f32.xlu0 %v1049_v35 }
 0x276   : > { %v1007_v38 = vmax.f32 %v965_v34, 0.0  ;;  %v960_v39 = vadd.f32 %v1765_v61, %v959_v36  ;;  %v1027_v41 = vmul.f32 %v1771_v1, %v1004_v33  ;;  %v1058_v47 = vsel %vm584_vm1, %v1028_v37, 0.0 }
 0x277   : > { %v1500_v42 = vpop.f32.mrf.mxu0  ;;  %1053 = vadd.xlane.f32.xlu1 %v1052_v40 }
 0x278   : > { %v1006_v43 = vmax.f32 %v960_v39, 0.0  ;;  %v975_v44 = vadd.f32 %v1500_v42, %v1765_v61  ;;  %v1055_v45 = vsel %vm584_vm1, %v1027_v41, 0.0  ;;  %v1030_v51 = vmul.f32 %v1771_v1, %v1007_v38 }
 0x279   : > { %v969_v46 = vpop.f32.mrf.mxu0  ;;  %1056 = vadd.xlane.f32.xlu0 %v1055_v45 }
 0x27a   : > { %v1009_v48 = vmax.f32 %v975_v44, 0.0  ;;  %v970_v49 = vadd.f32 %v1765_v61, %v969_v46  ;;  %v1029_v50 = vmul.f32 %v1771_v1, %v1006_v43  ;;  %v1064_v60 = vsel %vm584_vm1, %v1030_v51, 0.0 }
 0x27b   : > { %v1503_v52 = vpop.f32.mrf.mxu0  ;;  %1059 = vadd.xlane.f32.xlu1 %v1058_v47 }
 0x27c   : > { %v1008_v53 = vmax.f32 %v970_v49, 0.0  ;;  %v985_v54 = vadd.f32 %v1503_v52, %v1765_v61  ;;  %v1061_v55 = vsel %vm584_vm1, %v1029_v50, 0.0  ;;  %v1032_v57 = vmul.f32 %v1771_v1, %v1009_v48 }
 0x27d   : > { %v979_v56 = vpop.f32.mrf.mxu0  ;;  %1062 = vadd.xlane.f32.xlu0 %v1061_v55 }
 0x27e   : > { %v1011_v58 = vmax.f32 %v985_v54, 0.0  ;;  %v980_v59 = vadd.f32 %v1765_v61, %v979_v56  ;;  %v1031_v62 = vmul.f32 %v1771_v1, %v1008_v53  ;;  %v1070_v5 = vsel %vm584_vm1, %v1032_v57, 0.0 }
 0x27f   : > { %v1506_v63 = vpop.f32.mrf.mxu0  ;;  %1065 = vadd.xlane.f32.xlu1 %v1064_v60 }
 0x280   : > { %v1010_v0 = vmax.f32 %v980_v59, 0.0  ;;  %v995_v2 = vadd.f32 %v1506_v63, %v1765_v61  ;;  %v1067_v3 = vsel %vm584_vm1, %v1031_v62, 0.0  ;;  %v1034_v9 = vmul.f32 %v1771_v1, %v1011_v58 }
 0x281   : > { %v989_v4 = vpop.f32.mrf.mxu0  ;;  %1068 = vadd.xlane.f32.xlu0 %v1067_v3 }
 0x282   : > { %v1013_v6 = vmax.f32 %v995_v2, 0.0  ;;  %v990_v7 = vadd.f32 %v1765_v61, %v989_v4  ;;  %v1033_v8 = vmul.f32 %v1771_v1, %v1010_v0  ;;  %v1076_v12 = vsel %vm584_vm1, %v1034_v9, 0.0 }
 0x283   : > { %1071 = vadd.xlane.f32.xlu1 %v1070_v5 }
 0x284   : > { %v1012_v10 = vmax.f32 %v990_v7, 0.0  ;;  %v1073_v11 = vsel %vm584_vm1, %v1033_v8, 0.0  ;;  %v1036_v14 = vmul.f32 %v1771_v1, %v1013_v6 }
 0x285   : > { %1074 = vadd.xlane.f32.xlu0 %v1073_v11 }
 0x286   : > { %v1035_v13 = vmul.f32 %v1771_v1, %v1012_v10  ;;  %v1082_v61 = vsel %vm584_vm1, %v1036_v14, 0.0 }
 0x287   : > { %1077 = vadd.xlane.f32.xlu1 %v1076_v12 }
 0x288   : > { %v1079_v15 = vsel %vm584_vm1, %v1035_v13, 0.0 }
 0x289   : > { %1080 = vadd.xlane.f32.xlu0 %v1079_v15 }
 0x28b   : > { %1083 = vadd.xlane.f32.xlu1 %v1082_v61 }
 0x2f4   : > { %v1042_v17 = vpop.xlane.xlu0 %1041 }
 0x2f5   : > { %v1093_v18 = vadd.f32 %v1820_v16, %v1042_v17 }
 0x2f7   : > { %v1340_v19 = vmul.f32 -1.442695, %v1093_v18 }
 0x2f8   : > { %v1048_v20 = vpop.xlane.xlu1 %1047  ;;  %v1039_v21 = vpop.xlane.xlu0 %1038 }
 0x2f9   : > { %1519 = vpow2.f32 %v1340_v19  ;;  %v1095_v22 = vadd.f32 %v1820_v16, %v1048_v20  ;;  %v1092_v1 = vadd.f32 %v1820_v16, %v1039_v21 }
 0x2fb   : > { %v1342_v23 = vmul.f32 -1.442695, %v1095_v22  ;;  %v1339_v24 = vmul.f32 -1.442695, %v1092_v1 }
 0x2fc   : > { %v1045_v25 = vpop.xlane.xlu1 %1044 }
 0x2fd   : > { %1521 = vpow2.f32 %v1342_v23  ;;  %v1094_v26 = vadd.f32 %v1820_v16, %v1045_v25 }
 0x2fe   : > { %1523 = vpow2.f32 %v1339_v24  ;;  %v1051_v27 = vpop.xlane.xlu0 %1050 }
 0x2ff   : > { %v1341_v28 = vmul.f32 -1.442695, %v1094_v26  ;;  %v1096_v29 = vadd.f32 %v1820_v16, %v1051_v27 }
 0x300   : > { %v1054_v30 = vpop.xlane.xlu1 %1053 }
 0x301   : > { %1525 = vpow2.f32 %v1341_v28  ;;  %v1343_v31 = vmul.f32 -1.442695, %v1096_v29  ;;  %v1097_v32 = vadd.f32 %v1820_v16, %v1054_v30 }
 0x302   : > { %v1057_v33 = vpop.xlane.xlu0 %1056 }
 0x303   : > { %1527 = vpow2.f32 %v1343_v31  ;;  %v1344_v34 = vmul.f32 -1.442695, %v1097_v32  ;;  %v1098_v35 = vadd.f32 %v1820_v16, %v1057_v33 }
 0x304   : > { %v1060_v36 = vpop.xlane.xlu1 %1059 }
 0x305   : > { %1529 = vpow2.f32 %v1344_v34  ;;  %v1345_v37 = vmul.f32 -1.442695, %v1098_v35  ;;  %v1099_v38 = vadd.f32 %v1820_v16, %v1060_v36 }
 0x306   : > { %v1520_v39 = vpop.eup %1519  ;;  %v1063_v40 = vpop.xlane.xlu0 %1062 }
 0x307   : > { %v1157_v41 = vadd.f32 1.0, %v1520_v39  ;;  %1531 = vpow2.f32 %v1345_v37  ;;  %v1346_v42 = vmul.f32 -1.442695, %v1099_v38  ;;  %v1100_v43 = vadd.f32 %v1820_v16, %v1063_v40 }
 0x308   : > { %v1066_v44 = vpop.xlane.xlu1 %1065 }
 0x309   : > { %1533 = vrcp.f32 %v1157_v41  ;;  %v1347_v45 = vmul.f32 -1.442695, %v1100_v43  ;;  %v1101_v46 = vadd.f32 %v1820_v16, %v1066_v44 }
 0x30a   : > { %v1522_v47 = vpop.eup %1521  ;;  %1535 = vpow2.f32 %v1346_v42  ;;  %v1069_v48 = vpop.xlane.xlu0 %1068 }
 0x30b   : > { %v1524_v49 = vpop.eup %1523  ;;  %v1159_v50 = vadd.f32 1.0, %v1522_v47  ;;  %1537 = vpow2.f32 %v1347_v45  ;;  %v1348_v51 = vmul.f32 -1.442695, %v1101_v46  ;;  %v1102_v52 = vadd.f32 %v1820_v16, %v1069_v48 }
 0x30c   : > { %v1156_v53 = vadd.f32 1.0, %v1524_v49  ;;  %v1072_v54 = vpop.xlane.xlu1 %1071 }
 0x30d   : > { %1539 = vrcp.f32 %v1159_v50  ;;  %v1349_v55 = vmul.f32 -1.442695, %v1102_v52  ;;  %v1103_v56 = vadd.f32 %v1820_v16, %v1072_v54 }
 0x30e   : > { %v1526_v57 = vpop.eup %1525  ;;  %1541 = vrcp.f32 %v1156_v53  ;;  %v1075_v58 = vpop.xlane.xlu0 %1074 }
 0x30f   : > { %v1158_v59 = vadd.f32 1.0, %v1526_v57  ;;  %1543 = vpow2.f32 %v1348_v51  ;;  %v1350_v60 = vmul.f32 -1.442695, %v1103_v56  ;;  %v1104_v62 = vadd.f32 %v1820_v16, %v1075_v58 }
 0x310   : > { %v1528_v63 = vpop.eup %1527  ;;  %1545 = vpow2.f32 %v1349_v55  ;;  %v1078_v0 = vpop.xlane.xlu1 %1077 }
 0x311   : > { %1547 = vrcp.f32 %v1158_v59  ;;  %v1160_v2 = vadd.f32 1.0, %v1528_v63  ;;  %v1351_v3 = vmul.f32 -1.442695, %v1104_v62  ;;  %v1105_v4 = vadd.f32 %v1820_v16, %v1078_v0 }
 0x312   : > { %v1530_v5 = vpop.eup %1529  ;;  %1549 = vpow2.f32 %v1350_v60  ;;  %v1081_v6 = vpop.xlane.xlu0 %1080 }
 0x313   : > { %1551 = vrcp.f32 %v1160_v2  ;;  %v1161_v7 = vadd.f32 1.0, %v1530_v5  ;;  %v1352_v8 = vmul.f32 -1.442695, %v1105_v4  ;;  %v1106_v9 = vadd.f32 %v1820_v16, %v1081_v6 }
 0x314   : > { %v1532_v10 = vpop.eup %1531  ;;  %1553 = vpow2.f32 %v1351_v3  ;;  %v1084_v11 = vpop.xlane.xlu1 %1083 }
 0x315   : > { %1555 = vrcp.f32 %v1161_v7  ;;  %v1162_v12 = vadd.f32 1.0, %v1532_v10  ;;  %v1353_v13 = vmul.f32 -1.442695, %v1106_v9  ;;  %v1107_v14 = vadd.f32 %v1820_v16, %v1084_v11 }
 0x316   : > { %v1534_v15 = vpop.eup %1533  ;;  %1557 = vpow2.f32 %v1352_v8 }
 0x317   : > { %v1536_v61 = vpop.eup %1535  ;;  %1206 = vst.msk [vmem:[%s1842_s28 + $0x8] sm:$0xff] %vm1204_vm2, %v1534_v15  ;;  %1559 = vrcp.f32 %v1162_v12  ;;  %v1354_v17 = vmul.f32 -1.442695, %v1107_v14 }
 0x318   : > { %v1538_v18 = vpop.eup %1537  ;;  %v1163_v19 = vadd.f32 1.0, %v1536_v61  ;;  %1561 = vpow2.f32 %v1353_v13 }
 0x319   : > { %v1164_v20 = vadd.f32 1.0, %v1538_v18  ;;  %1563 = vpow2.f32 %v1354_v17 }
 0x31a   : > { %v1540_v21 = vpop.eup %1539  ;;  %1565 = vrcp.f32 %v1163_v19 }
 0x31b   : > { %v1542_v22 = vpop.eup %1541  ;;  %1208 = vst.msk [vmem:[%s1842_s28 + $0x18] sm:$0xff] %vm1204_vm2, %v1540_v21  ;;  %1567 = vrcp.f32 %v1164_v20 }
 0x31c   : > { %v1544_v16 = vpop.eup %1543  ;;  %1205 = vst.msk [vmem:[%s1842_s28] sm:$0xff] %vm1204_vm2, %v1542_v22 }
 0x31d   : > { %v1546_v1 = vpop.eup %1545  ;;  %v1165_v23 = vadd.f32 1.0, %v1544_v16 }
 0x31e   : > { %v1548_v24 = vpop.eup %1547  ;;  %v1166_v25 = vadd.f32 1.0, %v1546_v1 }
 0x31f   : > { %v1550_v26 = vpop.eup %1549  ;;  %1207 = vst.msk [vmem:[%s1842_s28 + $0x10] sm:$0xff] %vm1204_vm2, %v1548_v24  ;;  %1569 = vrcp.f32 %v1165_v23 }
 0x320   : > { %v1552_v27 = vpop.eup %1551  ;;  %1571 = vrcp.f32 %v1166_v25  ;;  %v1167_v28 = vadd.f32 1.0, %v1550_v26 }
 0x321   : > { %v1554_v29 = vpop.eup %1553  ;;  %1209 = vst.msk [vmem:[%s1842_s28 + $0x20] sm:$0xff] %vm1204_vm2, %v1552_v27 }
 0x322   : > { %v1556_v30 = vpop.eup %1555  ;;  %1573 = vrcp.f32 %v1167_v28  ;;  %v1168_v31 = vadd.f32 1.0, %v1554_v29 }
 0x323   : > { %v1558_v32 = vpop.eup %1557  ;;  %1210 = vst.msk [vmem:[%s1842_s28 + $0x28] sm:$0xff] %vm1204_vm2, %v1556_v30 }
 0x324   : > { %v1560_v33 = vpop.eup %1559  ;;  %1575 = vrcp.f32 %v1168_v31  ;;  %v1169_v34 = vadd.f32 1.0, %v1558_v32 }
 0x325   : > { %v1562_v35 = vpop.eup %1561  ;;  %1211 = vst.msk [vmem:[%s1842_s28 + $0x30] sm:$0xff] %vm1204_vm2, %v1560_v33 }
 0x326   : > { %v1564_v36 = vpop.eup %1563  ;;  %1577 = vrcp.f32 %v1169_v34  ;;  %v1170_v37 = vadd.f32 1.0, %v1562_v35 }
 0x327   : > { %v1566_v38 = vpop.eup %1565  ;;  %v1171_v39 = vadd.f32 1.0, %v1564_v36 }
 0x328   : > { %v1568_v40 = vpop.eup %1567  ;;  %1212 = vst.msk [vmem:[%s1842_s28 + $0x38] sm:$0xff] %vm1204_vm2, %v1566_v38  ;;  %1579 = vrcp.f32 %v1170_v37 }
 0x329   : > { %1213 = vst.msk [vmem:[%s1842_s28 + $0x40] sm:$0xff] %vm1204_vm2, %v1568_v40  ;;  %1581 = vrcp.f32 %v1171_v39 }
 0x32c   : > { %v1570_v41 = vpop.eup %1569 }
 0x32d   : > { %v1572_v42 = vpop.eup %1571  ;;  %1214 = vst.msk [vmem:[%s1842_s28 + $0x48] sm:$0xff] %vm1204_vm2, %v1570_v41 }
 0x32e   : > { %1215 = vst.msk [vmem:[%s1842_s28 + $0x50] sm:$0xff] %vm1204_vm2, %v1572_v42 }
 0x32f   : > { %v1574_v43 = vpop.eup %1573 }
 0x330   : > { %1216 = vst.msk [vmem:[%s1842_s28 + $0x58] sm:$0xff] %vm1204_vm2, %v1574_v43 }
 0x331   : > { %v1576_v44 = vpop.eup %1575 }
 0x332   : > { %1217 = vst.msk [vmem:[%s1842_s28 + $0x60] sm:$0xff] %vm1204_vm2, %v1576_v44 }
 0x333   : > { %v1578_v45 = vpop.eup %1577 }
 0x334   : > { %1218 = vst.msk [vmem:[%s1842_s28 + $0x68] sm:$0xff] %vm1204_vm2, %v1578_v45 }
 0x335   : > { %v1580_v46 = vpop.eup %1579 }
 0x336   : > { %v1582_v47 = vpop.eup %1581  ;;  %1219 = vst.msk [vmem:[%s1842_s28 + $0x70] sm:$0xff] %vm1204_vm2, %v1580_v46 }
 0x337   : > { %1220 = vst.msk [vmem:[%s1842_s28 + $0x78] sm:$0xff] %vm1204_vm2, %v1582_v47 }
 0x338 PF: > { %s21_s11 = sadd.s32 1, %s1589_s11  }
 0x339   : > { %p18_p4 = scmp.ge.s32.totalorder %s21_s11, 4  }
 0x33b   :  { %20 = sbr.rel (!%p18_p4) target bundleno = 3 (0x3), region = 86 }

</bundles_post_ra>
